<compile_context>
chip_gen: v6e
topology: v6e:2x2x1
jax: 0.10.0
libtpu: 0.0.40
codegen_flags: <defaults>
</compile_context>

<pallas_src>
import jax
import jax.numpy as jnp
import numpy as np
from jax import lax
from jax.experimental import pallas as pl
from jax.experimental.pallas import tpu as pltpu


def _activation_epilogue(y, activation):
    if activation == "none":
        return y
    if activation == "relu":
        return jnp.maximum(y, 0.0)
    if activation == "leaky":
        return jnp.where(y > 0.0, y, 0.1 * y)
    if activation == "mish":
        # mish(x) = x * tanh(softplus(x)); with e = exp(x):
        #   tanh(log(1+e)) = t / (t + 2),  t = e * (e + 2)
        e = jnp.exp(jnp.minimum(y, 20.0))
        t = e * (e + 2.0)
        den = t + 2.0
        r = pl.reciprocal(den, approx=True)
        r = r * (2.0 - den * r)            # one Newton step (VPU) -> ~f32 accuracy
        mish_y = y * t * r
        # For x > 20, softplus(x) ~= x and tanh(x) ~= 1 in f32 -> mish(x) ~= x.
        return jnp.where(y > 20.0, y, mish_y)
    raise ValueError(f"unknown activation: {activation}")


def _make_fused_kernel(K, dilation, padding, W, HW, margin, activation):
    # Flat-index offset of each depthwise tap (kh, kw) relative to the output position.
    offs = [(kh * dilation - padding) * W + (kw * dilation - padding)
            for kh in range(K) for kw in range(K)]

    def kernel(x_ref, wdw_ref, mask_ref, wpw_ref, bpw_ref, o_ref, xext_ref):
        cin = x_ref.shape[0]
        cout = o_ref.shape[0]

        # ---- fold the conv zero-padding into the kernel: zero-margined flat image ----
        xext_ref[...] = jnp.zeros_like(xext_ref)
        xext_ref[:, margin:margin + HW] = x_ref[...].astype(jnp.float32)

        wdw = wdw_ref[...].astype(jnp.float32)     # (cin, K*K)
        masks = mask_ref[...]                      # (K*K, HW), 0/1 validity per tap
        wpw = wpw_ref[...].astype(jnp.float32)     # (cout, cin), BN scale folded in
        bpw = bpw_ref[...].astype(jnp.float32)     # (cout, 1), all biases + BN shift folded in

        # ---- depthwise KxK conv: K*K shifted, masked, per-channel-scaled FMAs (VPU) ----
        acc = jnp.zeros((cin, HW), jnp.float32)
        for t, off in enumerate(offs):
            tap = xext_ref[:, margin + off:margin + off + HW]   # (cin, HW) static-offset slice
            acc = acc + tap * wdw[:, t:t + 1] * masks[t:t + 1, :]

        # ---- 1x1 pointwise conv (+ folded BatchNorm) as Cin outer-product FMAs (VPU) ----
        y = jnp.zeros((cout, HW), jnp.float32)
        for ci in range(cin):
            y = y + wpw[:, ci:ci + 1] * acc[ci:ci + 1, :]
        y = y + bpw

        # ---- activation epilogue, single lane-dense store ----
        y = _activation_epilogue(y, activation)
        o_ref[...] = y.astype(o_ref.dtype)

    return kernel


def separable_conv_bn_act(x, params, *, stride=1, padding=0, dilation=1,
                          activation="none", eps=1e-5):
    """Forward pass of SeparableConvBnActivation (inference-mode BatchNorm).

    x: (N, Cin, H, W) float32 (NCHW, PyTorch layout).
    params:
      w_dw (Cin,1,K,K), b_dw (Cin,), w_pw (Cout,Cin,1,1), b_pw (Cout,),
      gamma / beta / mean / var (Cout,)  -- BatchNorm2d affine + running stats.
    """
    n, cin, h, w = x.shape
    cout = params["w_pw"].shape[0]
    K = params["w_dw"].shape[-1]
    hw = h * w

    if 2 * padding > dilation * (K - 1):
        # TODO(synk): over-padded configs (output larger than the input grid) would need a
        #             larger dense grid; valid / "same" padding (the common cases) are covered.
        raise NotImplementedError("padding larger than 'same' padding is not supported")

    h_out = (h + 2 * padding - dilation * (K - 1) - 1) // stride + 1
    w_out = (w + 2 * padding - dilation * (K - 1) - 1) // stride + 1

    # Zero margin so every tap's shifted slice stays in bounds of the scratch buffer.
    margin = max(padding, dilation * (K - 1) - padding) * (w + 1)

    # Per-tap validity masks (shape-only, computed once on host): zero where the tap's source
    # pixel falls in the conv zero-padding region (or wraps across a row in the flat layout).
    oh = np.arange(h)[:, None]
    ow = np.arange(w)[None, :]
    mask_list = []
    for kh in range(K):
        for kw in range(K):
            r = oh + kh * dilation - padding
            c = ow + kw * dilation - padding
            m = (r >= 0) & (r < h) & (c >= 0) & (c < w)
            mask_list.append(m.astype(np.float32).reshape(hw))
    masks = jnp.asarray(np.stack(mask_list, axis=0))                      # (K*K, hw)

    # Depthwise weights (Cin,1,K,K) -> (Cin, K*K).
    w_dw = params["w_dw"].reshape(cin, K * K).astype(jnp.float32)

    # Fold inference BatchNorm and both biases:
    #   BN(Wpw (DW(x) + b_dw) + b_pw) = (s*Wpw) DW(x) + [s*(Wpw b_dw + b_pw - mean) + beta]
    s_bn = params["gamma"] / jnp.sqrt(params["var"] + eps)
    w_pw = params["w_pw"].reshape(cout, cin)
    w_fold = (w_pw * s_bn[:, None]).astype(jnp.float32)                   # (Cout, Cin)
    b_fold = (s_bn * (params["b_pw"] + w_pw @ params["b_dw"] - params["mean"])
              + params["beta"]).reshape(cout, 1).astype(jnp.float32)      # (Cout, 1)

    # Free (contiguous) reshape: flattened spatial axis goes on the 128-lane axis.
    x_flat = x.reshape(n, cin, hw)

    # Conservative VMEM working-set check (v7x has only 64 MiB per TensorCore).
    ws_bytes = 4 * (2 * cin * hw + 2 * cout * hw + cin * (hw + 2 * margin)
                    + K * K * hw + cin * K * K + cout * (cin + 1))
    assert ws_bytes <= 16 * 2 ** 20, (
        f"per-step working set {ws_bytes} B exceeds the VMEM budget; "
        "use a row-tiled (halo) pipeline for this image size")

    kernel = _make_fused_kernel(K, dilation, padding, w, hw, margin, activation)

    out_flat = pl.pallas_call(
        kernel,
        out_shape=jax.ShapeDtypeStruct((n, cout, hw), x.dtype),
        grid=(n,),
        in_specs=[
            pl.BlockSpec((None, cin, hw), lambda i: (i, 0, 0)),   # one image / step
            pl.BlockSpec((cin, K * K), lambda i: (0, 0)),
            pl.BlockSpec((K * K, hw), lambda i: (0, 0)),
            pl.BlockSpec((cout, cin), lambda i: (0, 0)),
            pl.BlockSpec((cout, 1), lambda i: (0, 0)),
        ],
        out_specs=pl.BlockSpec((None, cout, hw), lambda i: (i, 0, 0)),
        scratch_shapes=[pltpu.VMEM((cin, hw + 2 * margin), jnp.float32)],
        compiler_params=pltpu.CompilerParams(
            dimension_semantics=("parallel",),          # batch axis -> both TCs on v7x
            vmem_limit_bytes=24 * 1024 * 1024,          # explicit cap, safe on v7x's 64 MiB
        ),
    )(x_flat, w_dw, masks, w_fold, b_fold)

    # The kernel computes the dense stride-1 output over the full H*W grid; for same-padding /
    # stride-1 (the module's common config and the test) this is exactly the output.  Otherwise
    # crop / subsample once in the wrapper (reshape below is contiguous -> free).
    out = out_flat.reshape(n, cout, h, w)
    if stride != 1 or h_out != h or w_out != w:
        out = out[:, :, :(h_out - 1) * stride + 1:stride,
                  :(w_out - 1) * stride + 1:stride]
    return out


def _ref_forward(x, params, *, stride, padding, dilation, activation, eps):
    """Pure-JAX reference matching the PyTorch module (eval-mode BN)."""
    cin = x.shape[1]
    dw = lax.conv_general_dilated(
        x, params["w_dw"],
        window_strides=(stride, stride),
        padding=[(padding, padding), (padding, padding)],
        rhs_dilation=(dilation, dilation),
        dimension_numbers=("NCHW", "OIHW", "NCHW"),
        feature_group_count=cin,
        precision=lax.Precision.HIGHEST)
    dw = dw + params["b_dw"][None, :, None, None]
    pw = lax.conv_general_dilated(
        dw, params["w_pw"],
        window_strides=(1, 1),
        padding=[(0, 0), (0, 0)],
        dimension_numbers=("NCHW", "OIHW", "NCHW"),
        precision=lax.Precision.HIGHEST)
    pw = pw + params["b_pw"][None, :, None, None]
    s = params["gamma"] / jnp.sqrt(params["var"] + eps)
    y = pw * s[None, :, None, None] + (params["beta"] - s * params["mean"])[None, :, None, None]
    if activation == "mish":
        y = y * jnp.tanh(jax.nn.softplus(y))
    elif activation == "relu":
        y = jnp.maximum(y, 0.0)
    elif activation == "leaky":
        y = jnp.where(y > 0.0, y, 0.1 * y)
    return y


if __name__ == "__main__":
    N, Cin, H, W = 2, 4, 16, 16
    Cout, K = 8, 3
    stride, padding, dilation = 1, 1, 1
    activation = "mish"
    eps = 1e-5

    key = jax.random.PRNGKey(0)
    ks = jax.random.split(key, 9)
    params = {
        "w_dw": jax.random.normal(ks[0], (Cin, 1, K, K), jnp.float32) * 0.2,
        "b_dw": jax.random.normal(ks[1], (Cin,), jnp.float32) * 0.1,
        "w_pw": jax.random.normal(ks[2], (Cout, Cin, 1, 1), jnp.float32) * 0.3,
        "b_pw": jax.random.normal(ks[3], (Cout,), jnp.float32) * 0.1,
        "gamma": 1.0 + 0.1 * jax.random.normal(ks[4], (Cout,), jnp.float32),
        "beta": 0.1 * jax.random.normal(ks[5], (Cout,), jnp.float32),
        "mean": 0.1 * jax.random.normal(ks[6], (Cout,), jnp.float32),
        "var": jax.random.uniform(ks[7], (Cout,), jnp.float32, minval=0.5, maxval=1.5),
    }
    x = jax.random.normal(ks[8], (N, Cin, H, W), jnp.float32)

    y = separable_conv_bn_act(x, params, stride=stride, padding=padding,
                              dilation=dilation, activation=activation, eps=eps)
    y = jax.block_until_ready(y)

    y_ref = _ref_forward(x, params, stride=stride, padding=padding,
                         dilation=dilation, activation=activation, eps=eps)

    assert y.shape == y_ref.shape and y.dtype == x.dtype
    # All-f32 path: kernel and reference agree to ~1e-6; keep a small safety margin.
    err = float(jnp.max(jnp.abs(y - y_ref)))
    assert jnp.allclose(y, y_ref, atol=1e-4, rtol=1e-4), err
    print("KERNEL_OK")
</pallas_src>

<mosaic_0001>
module attributes {stable_mosaic.version = 11 : i64} {
  func.func @kernel(%arg0: i32, %arg1: memref<1x4x256xf32, #tpu.memory_space<vmem>>, %arg2: memref<4x9xf32, #tpu.memory_space<vmem>>, %arg3: memref<9x256xf32, #tpu.memory_space<vmem>>, %arg4: memref<8x4xf32, #tpu.memory_space<vmem>>, %arg5: memref<8x1xf32, #tpu.memory_space<vmem>>, %arg6: memref<1x8x256xf32, #tpu.memory_space<vmem>>, %arg7: memref<4x290xf32, #tpu.memory_space<vmem>>) attributes {dimension_semantics = [#tpu.dimension_semantics<parallel>], iteration_bounds = array<i64: 2>, scalar_prefetch = 0 : i64, scratch_operands = 1 : i64, tpu.core_type = #tpu.core_type<tc>, window_params = [{transform_indices = @transform_0, window_bounds = array<i64: 1, 4, 256>}, {pipeline_mode = #tpu.pipeline_mode<synchronous>, transform_indices = @transform_1, window_bounds = array<i64: 4, 9>}, {pipeline_mode = #tpu.pipeline_mode<synchronous>, transform_indices = @transform_2, window_bounds = array<i64: 9, 256>}, {pipeline_mode = #tpu.pipeline_mode<synchronous>, transform_indices = @transform_3, window_bounds = array<i64: 8, 4>}, {pipeline_mode = #tpu.pipeline_mode<synchronous>, transform_indices = @transform_4, window_bounds = array<i64: 8, 1>}, {transform_indices = @transform_5, window_bounds = array<i64: 1, 8, 256>}]} {
    %cst = arith.constant 0.000000e+00 : f32
    %0 = vector.broadcast %cst : f32 to vector<4x290xf32>
    %c0 = arith.constant 0 : index
    %c0_0 = arith.constant 0 : index
    %1 = vector.load %arg7[%c0, %c0_0] : memref<4x290xf32, #tpu.memory_space<vmem>>, vector<4x290xf32>
    tpu.vector_store %arg7[%c0, %c0_0], %0 {strides = array<i32>} : memref<4x290xf32, #tpu.memory_space<vmem>>, vector<4x290xf32>,
    %c0_1 = arith.constant 0 : index
    %c0_2 = arith.constant 0 : index
    %c0_3 = arith.constant 0 : index
    %2 = vector.load %arg1[%c0_1, %c0_2, %c0_3] : memref<1x4x256xf32, #tpu.memory_space<vmem>>, vector<1x4x256xf32>
    %3 = vector.shape_cast %2 : vector<1x4x256xf32> to vector<4x256xf32>
    %c0_4 = arith.constant 0 : index
    %c17 = arith.constant 17 : index
    %4 = vector.load %arg7[%c0_4, %c17] : memref<4x290xf32, #tpu.memory_space<vmem>>, vector<4x256xf32>
    tpu.vector_store %arg7[%c0_4, %c17], %3 {strides = array<i32>} : memref<4x290xf32, #tpu.memory_space<vmem>>, vector<4x256xf32>,
    %c0_5 = arith.constant 0 : index
    %c0_6 = arith.constant 0 : index
    %5 = vector.load %arg2[%c0_5, %c0_6] : memref<4x9xf32, #tpu.memory_space<vmem>>, vector<4x9xf32>
    %c0_7 = arith.constant 0 : index
    %c0_8 = arith.constant 0 : index
    %6 = vector.load %arg3[%c0_7, %c0_8] : memref<9x256xf32, #tpu.memory_space<vmem>>, vector<9x256xf32>
    %c0_9 = arith.constant 0 : index
    %c0_10 = arith.constant 0 : index
    %7 = vector.load %arg4[%c0_9, %c0_10] : memref<8x4xf32, #tpu.memory_space<vmem>>, vector<8x4xf32>
    %c0_11 = arith.constant 0 : index
    %c0_12 = arith.constant 0 : index
    %8 = vector.load %arg5[%c0_11, %c0_12] : memref<8x1xf32, #tpu.memory_space<vmem>>, vector<8x1xf32>
    %cst_13 = arith.constant 0.000000e+00 : f32
    %9 = vector.broadcast %cst_13 : f32 to vector<4x256xf32>
    %c0_14 = arith.constant 0 : index
    %c0_15 = arith.constant 0 : index
    %10 = vector.load %arg7[%c0_14, %c0_15] : memref<4x290xf32, #tpu.memory_space<vmem>>, vector<4x256xf32>
    %11 = vector.extract_strided_slice %5 {offsets = [0, 0], sizes = [4, 1], strides = [1, 1]} : vector<4x9xf32> to vector<4x1xf32>
    %12 = vector.broadcast %11 : vector<4x1xf32> to vector<4x256xf32>
    %13 = arith.mulf %10, %12 : vector<4x256xf32>
    %14 = vector.extract_strided_slice %6 {offsets = [0, 0], sizes = [1, 256], strides = [1, 1]} : vector<9x256xf32> to vector<1x256xf32>
    %15 = vector.broadcast %14 : vector<1x256xf32> to vector<4x256xf32>
    %16 = arith.mulf %13, %15 : vector<4x256xf32>
    %17 = arith.addf %9, %16 : vector<4x256xf32>
    %c0_16 = arith.constant 0 : index
    %c1 = arith.constant 1 : index
    %18 = vector.load %arg7[%c0_16, %c1] : memref<4x290xf32, #tpu.memory_space<vmem>>, vector<4x256xf32>
    %19 = vector.extract_strided_slice %5 {offsets = [0, 1], sizes = [4, 1], strides = [1, 1]} : vector<4x9xf32> to vector<4x1xf32>
    %20 = vector.broadcast %19 : vector<4x1xf32> to vector<4x256xf32>
    %21 = arith.mulf %18, %20 : vector<4x256xf32>
    %22 = vector.extract_strided_slice %6 {offsets = [1, 0], sizes = [1, 256], strides = [1, 1]} : vector<9x256xf32> to vector<1x256xf32>
    %23 = vector.broadcast %22 : vector<1x256xf32> to vector<4x256xf32>
    %24 = arith.mulf %21, %23 : vector<4x256xf32>
    %25 = arith.addf %17, %24 : vector<4x256xf32>
    %c0_17 = arith.constant 0 : index
    %c2 = arith.constant 2 : index
    %26 = vector.load %arg7[%c0_17, %c2] : memref<4x290xf32, #tpu.memory_space<vmem>>, vector<4x256xf32>
    %27 = vector.extract_strided_slice %5 {offsets = [0, 2], sizes = [4, 1], strides = [1, 1]} : vector<4x9xf32> to vector<4x1xf32>
    %28 = vector.broadcast %27 : vector<4x1xf32> to vector<4x256xf32>
    %29 = arith.mulf %26, %28 : vector<4x256xf32>
    %30 = vector.extract_strided_slice %6 {offsets = [2, 0], sizes = [1, 256], strides = [1, 1]} : vector<9x256xf32> to vector<1x256xf32>
    %31 = vector.broadcast %30 : vector<1x256xf32> to vector<4x256xf32>
    %32 = arith.mulf %29, %31 : vector<4x256xf32>
    %33 = arith.addf %25, %32 : vector<4x256xf32>
    %c0_18 = arith.constant 0 : index
    %c16 = arith.constant 16 : index
    %34 = vector.load %arg7[%c0_18, %c16] : memref<4x290xf32, #tpu.memory_space<vmem>>, vector<4x256xf32>
    %35 = vector.extract_strided_slice %5 {offsets = [0, 3], sizes = [4, 1], strides = [1, 1]} : vector<4x9xf32> to vector<4x1xf32>
    %36 = vector.broadcast %35 : vector<4x1xf32> to vector<4x256xf32>
    %37 = arith.mulf %34, %36 : vector<4x256xf32>
    %38 = vector.extract_strided_slice %6 {offsets = [3, 0], sizes = [1, 256], strides = [1, 1]} : vector<9x256xf32> to vector<1x256xf32>
    %39 = vector.broadcast %38 : vector<1x256xf32> to vector<4x256xf32>
    %40 = arith.mulf %37, %39 : vector<4x256xf32>
    %41 = arith.addf %33, %40 : vector<4x256xf32>
    %c0_19 = arith.constant 0 : index
    %c17_20 = arith.constant 17 : index
    %42 = vector.load %arg7[%c0_19, %c17_20] : memref<4x290xf32, #tpu.memory_space<vmem>>, vector<4x256xf32>
    %43 = vector.extract_strided_slice %5 {offsets = [0, 4], sizes = [4, 1], strides = [1, 1]} : vector<4x9xf32> to vector<4x1xf32>
    %44 = vector.broadcast %43 : vector<4x1xf32> to vector<4x256xf32>
    %45 = arith.mulf %42, %44 : vector<4x256xf32>
    %46 = vector.extract_strided_slice %6 {offsets = [4, 0], sizes = [1, 256], strides = [1, 1]} : vector<9x256xf32> to vector<1x256xf32>
    %47 = vector.broadcast %46 : vector<1x256xf32> to vector<4x256xf32>
    %48 = arith.mulf %45, %47 : vector<4x256xf32>
    %49 = arith.addf %41, %48 : vector<4x256xf32>
    %c0_21 = arith.constant 0 : index
    %c18 = arith.constant 18 : index
    %50 = vector.load %arg7[%c0_21, %c18] : memref<4x290xf32, #tpu.memory_space<vmem>>, vector<4x256xf32>
    %51 = vector.extract_strided_slice %5 {offsets = [0, 5], sizes = [4, 1], strides = [1, 1]} : vector<4x9xf32> to vector<4x1xf32>
    %52 = vector.broadcast %51 : vector<4x1xf32> to vector<4x256xf32>
    %53 = arith.mulf %50, %52 : vector<4x256xf32>
    %54 = vector.extract_strided_slice %6 {offsets = [5, 0], sizes = [1, 256], strides = [1, 1]} : vector<9x256xf32> to vector<1x256xf32>
    %55 = vector.broadcast %54 : vector<1x256xf32> to vector<4x256xf32>
    %56 = arith.mulf %53, %55 : vector<4x256xf32>
    %57 = arith.addf %49, %56 : vector<4x256xf32>
    %c0_22 = arith.constant 0 : index
    %c32 = arith.constant 32 : index
    %58 = vector.load %arg7[%c0_22, %c32] : memref<4x290xf32, #tpu.memory_space<vmem>>, vector<4x256xf32>
    %59 = vector.extract_strided_slice %5 {offsets = [0, 6], sizes = [4, 1], strides = [1, 1]} : vector<4x9xf32> to vector<4x1xf32>
    %60 = vector.broadcast %59 : vector<4x1xf32> to vector<4x256xf32>
    %61 = arith.mulf %58, %60 : vector<4x256xf32>
    %62 = vector.extract_strided_slice %6 {offsets = [6, 0], sizes = [1, 256], strides = [1, 1]} : vector<9x256xf32> to vector<1x256xf32>
    %63 = vector.broadcast %62 : vector<1x256xf32> to vector<4x256xf32>
    %64 = arith.mulf %61, %63 : vector<4x256xf32>
    %65 = arith.addf %57, %64 : vector<4x256xf32>
    %c0_23 = arith.constant 0 : index
    %c33 = arith.constant 33 : index
    %66 = vector.load %arg7[%c0_23, %c33] : memref<4x290xf32, #tpu.memory_space<vmem>>, vector<4x256xf32>
    %67 = vector.extract_strided_slice %5 {offsets = [0, 7], sizes = [4, 1], strides = [1, 1]} : vector<4x9xf32> to vector<4x1xf32>
    %68 = vector.broadcast %67 : vector<4x1xf32> to vector<4x256xf32>
    %69 = arith.mulf %66, %68 : vector<4x256xf32>
    %70 = vector.extract_strided_slice %6 {offsets = [7, 0], sizes = [1, 256], strides = [1, 1]} : vector<9x256xf32> to vector<1x256xf32>
    %71 = vector.broadcast %70 : vector<1x256xf32> to vector<4x256xf32>
    %72 = arith.mulf %69, %71 : vector<4x256xf32>
    %73 = arith.addf %65, %72 : vector<4x256xf32>
    %c0_24 = arith.constant 0 : index
    %c34 = arith.constant 34 : index
    %74 = vector.load %arg7[%c0_24, %c34] : memref<4x290xf32, #tpu.memory_space<vmem>>, vector<4x256xf32>
    %75 = vector.extract_strided_slice %5 {offsets = [0, 8], sizes = [4, 1], strides = [1, 1]} : vector<4x9xf32> to vector<4x1xf32>
    %76 = vector.broadcast %75 : vector<4x1xf32> to vector<4x256xf32>
    %77 = arith.mulf %74, %76 : vector<4x256xf32>
    %78 = vector.extract_strided_slice %6 {offsets = [8, 0], sizes = [1, 256], strides = [1, 1]} : vector<9x256xf32> to vector<1x256xf32>
    %79 = vector.broadcast %78 : vector<1x256xf32> to vector<4x256xf32>
    %80 = arith.mulf %77, %79 : vector<4x256xf32>
    %81 = arith.addf %73, %80 : vector<4x256xf32>
    %cst_25 = arith.constant 0.000000e+00 : f32
    %82 = vector.broadcast %cst_25 : f32 to vector<8x256xf32>
    %83 = vector.extract_strided_slice %7 {offsets = [0, 0], sizes = [8, 1], strides = [1, 1]} : vector<8x4xf32> to vector<8x1xf32>
    %84 = vector.extract_strided_slice %81 {offsets = [0, 0], sizes = [1, 256], strides = [1, 1]} : vector<4x256xf32> to vector<1x256xf32>
    %85 = vector.broadcast %83 : vector<8x1xf32> to vector<8x256xf32>
    %86 = vector.broadcast %84 : vector<1x256xf32> to vector<8x256xf32>
    %87 = arith.mulf %85, %86 : vector<8x256xf32>
    %88 = arith.addf %82, %87 : vector<8x256xf32>
    %89 = vector.extract_strided_slice %7 {offsets = [0, 1], sizes = [8, 1], strides = [1, 1]} : vector<8x4xf32> to vector<8x1xf32>
    %90 = vector.extract_strided_slice %81 {offsets = [1, 0], sizes = [1, 256], strides = [1, 1]} : vector<4x256xf32> to vector<1x256xf32>
    %91 = vector.broadcast %89 : vector<8x1xf32> to vector<8x256xf32>
    %92 = vector.broadcast %90 : vector<1x256xf32> to vector<8x256xf32>
    %93 = arith.mulf %91, %92 : vector<8x256xf32>
    %94 = arith.addf %88, %93 : vector<8x256xf32>
    %95 = vector.extract_strided_slice %7 {offsets = [0, 2], sizes = [8, 1], strides = [1, 1]} : vector<8x4xf32> to vector<8x1xf32>
    %96 = vector.extract_strided_slice %81 {offsets = [2, 0], sizes = [1, 256], strides = [1, 1]} : vector<4x256xf32> to vector<1x256xf32>
    %97 = vector.broadcast %95 : vector<8x1xf32> to vector<8x256xf32>
    %98 = vector.broadcast %96 : vector<1x256xf32> to vector<8x256xf32>
    %99 = arith.mulf %97, %98 : vector<8x256xf32>
    %100 = arith.addf %94, %99 : vector<8x256xf32>
    %101 = vector.extract_strided_slice %7 {offsets = [0, 3], sizes = [8, 1], strides = [1, 1]} : vector<8x4xf32> to vector<8x1xf32>
    %102 = vector.extract_strided_slice %81 {offsets = [3, 0], sizes = [1, 256], strides = [1, 1]} : vector<4x256xf32> to vector<1x256xf32>
    %103 = vector.broadcast %101 : vector<8x1xf32> to vector<8x256xf32>
    %104 = vector.broadcast %102 : vector<1x256xf32> to vector<8x256xf32>
    %105 = arith.mulf %103, %104 : vector<8x256xf32>
    %106 = arith.addf %100, %105 : vector<8x256xf32>
    %107 = vector.broadcast %8 : vector<8x1xf32> to vector<8x256xf32>
    %108 = arith.addf %106, %107 : vector<8x256xf32>
    %cst_26 = arith.constant 2.000000e+01 : f32
    %109 = vector.broadcast %cst_26 : f32 to vector<8x256xf32>
    %110 = arith.minimumf %108, %109 : vector<8x256xf32>
    %111 = math.exp %110 : vector<8x256xf32>
    %cst_27 = arith.constant 2.000000e+00 : f32
    %112 = vector.broadcast %cst_27 : f32 to vector<8x256xf32>
    %113 = arith.addf %111, %112 : vector<8x256xf32>
    %114 = arith.mulf %111, %113 : vector<8x256xf32>
    %cst_28 = arith.constant 2.000000e+00 : f32
    %115 = vector.broadcast %cst_28 : f32 to vector<8x256xf32>
    %116 = arith.addf %114, %115 : vector<8x256xf32>
    %117 = tpu.reciprocal %116 {approx = true} : vector<8x256xf32> -> vector<8x256xf32>
    %118 = arith.mulf %116, %117 : vector<8x256xf32>
    %cst_29 = arith.constant 2.000000e+00 : f32
    %119 = vector.broadcast %cst_29 : f32 to vector<8x256xf32>
    %120 = arith.subf %119, %118 : vector<8x256xf32>
    %121 = arith.mulf %117, %120 : vector<8x256xf32>
    %122 = arith.mulf %108, %114 : vector<8x256xf32>
    %123 = arith.mulf %122, %121 : vector<8x256xf32>
    %cst_30 = arith.constant 2.000000e+01 : f32
    %124 = vector.broadcast %cst_30 : f32 to vector<8x256xf32>
    %125 = arith.cmpf ogt, %108, %124 : vector<8x256xf32>
    %126 = arith.select %125, %108, %123 : vector<8x256xi1>, vector<8x256xf32>
    %c0_31 = arith.constant 0 : index
    %c0_32 = arith.constant 0 : index
    %c0_33 = arith.constant 0 : index
    %127 = vector.load %arg6[%c0_31, %c0_32, %c0_33] : memref<1x8x256xf32, #tpu.memory_space<vmem>>, vector<1x8x256xf32>
    %128 = vector.shape_cast %127 : vector<1x8x256xf32> to vector<8x256xf32>
    %129 = vector.shape_cast %126 : vector<8x256xf32> to vector<1x8x256xf32>
    tpu.vector_store %arg6[%c0_31, %c0_32, %c0_33], %129 {strides = array<i32>} : memref<1x8x256xf32, #tpu.memory_space<vmem>>, vector<1x8x256xf32>,
    return
  }
  func.func @transform_0(%arg0: i32) -> (i32, i32, i32) {
    %c0_i32 = arith.constant 0 : i32
    %c0_i32_0 = arith.constant 0 : i32
    %c0_i32_1 = arith.constant 0 : i32
    return %arg0, %c0_i32, %c0_i32_0 : i32, i32, i32
  }
  func.func @transform_1(%arg0: i32) -> (i32, i32) {
    %c0_i32 = arith.constant 0 : i32
    %c0_i32_0 = arith.constant 0 : i32
    %c0_i32_1 = arith.constant 0 : i32
    return %c0_i32, %c0_i32_0 : i32, i32
  }
  func.func @transform_2(%arg0: i32) -> (i32, i32) {
    %c0_i32 = arith.constant 0 : i32
    %c0_i32_0 = arith.constant 0 : i32
    %c0_i32_1 = arith.constant 0 : i32
    return %c0_i32, %c0_i32_0 : i32, i32
  }
  func.func @transform_3(%arg0: i32) -> (i32, i32) {
    %c0_i32 = arith.constant 0 : i32
    %c0_i32_0 = arith.constant 0 : i32
    %c0_i32_1 = arith.constant 0 : i32
    return %c0_i32, %c0_i32_0 : i32, i32
  }
  func.func @transform_4(%arg0: i32) -> (i32, i32) {
    %c0_i32 = arith.constant 0 : i32
    %c0_i32_0 = arith.constant 0 : i32
    %c0_i32_1 = arith.constant 0 : i32
    return %c0_i32, %c0_i32_0 : i32, i32
  }
  func.func @transform_5(%arg0: i32) -> (i32, i32, i32) {
    %c0_i32 = arith.constant 0 : i32
    %c0_i32_0 = arith.constant 0 : i32
    %c0_i32_1 = arith.constant 0 : i32
    return %arg0, %c0_i32, %c0_i32_0 : i32, i32, i32
  }
}

</mosaic_0001>

<bundles_post_ra>
// kernel: tpu_custom_call.1
= control target key start
LH: loop header
LB: loop body
LE: loop exit
PB: predicated region body
PF: predicated region fallthrough
CT: control target
= control target key end

     0   :  { %10 = vsyncpa [#allocation4], 0  ;;  %s1440_s0 = inlined_call_operand.vmem [shape: f32[2,4,256], index: 0, kind: input, shape index: {}]   ;;  %s1441_s1 = inlined_call_operand.vmem [shape: f32[4,9], index: 1, kind: input, shape index: {}]   ;;  %s1442_s2 = inlined_call_operand.hbm [shape: f32[9,256], index: 2, kind: input, shape index: {}]   ;;  %s1443_s3 = inlined_call_operand.vmem [shape: f32[8,4], index: 3, kind: input, shape index: {}]   ;;  %s1444_s4 = inlined_call_operand.vmem [shape: f32[8,1], index: 4, kind: input, shape index: {}]   ;;  %s1445_s5 = inlined_call_operand.hbm [shape: f32[2,8,256], index: 5, kind: output, shape index: {}]  }
   0x1   :  { %11 = vsyncpa [#allocation5], 0 }
   0x2   :  { %13 = vsyncpa [#allocation5 + $0x1], 0  ;;  %s1177_s18 = smov 0   ;;  %s1179_s19 = smov 0  }
   0x3   :  { %s1181_s20 = smov 0   ;;  %s1183_s21 = smov 0  }
   0x4 LB: > { %s1198_s22 = sadd.s32 4294967295, %s1114_s21   ;;  %s904_s23 = sadd.s32 4294967294, %s1114_s21   ;;  %s1114_s21 = sphi %s1183_s21, %s1453_s21   ;;  %s1110_s20 = sphi %s1181_s20, %s1452_s20   ;;  %s1106_s19 = sphi %s1179_s19, %s1451_s19   ;;  %s1102_s18 = sphi %s1177_s18, %s1450_s18  }
   0x5   : > { %s1202_s24 = sadd.s32 1, %s1114_s21   ;;  %s136_s25 = sadd.s32 1, %s1110_s20 }
   0x6   : > { %s133_s26 = ssub.s32 %s1114_s21, %s1202_s24  ;;  %p146_p0 = scmp.ne.s32.totalorder %s1110_s20, %s1106_s19 }
   0x7   : > { %p134_p1 = scmp.eq.s32.totalorder %s133_s26, 0  ;;  %p147_p2 = scmp.eq.s32.totalorder %s1198_s22, 1 }
   0x8   : > { %p152_p3 = scmp.ne.s32.totalorder %s1106_s19, %s1102_s18  ;;  %p153_p4 = scmp.eq.s32.totalorder %s904_s23, 1 }
   0x9   : > { %s1213_s27 = scalar_select %p134_p1, %s1110_s20, %s136_s25  }
   0xa   : > { %p1215_p5 = por %p147_p2, %p146_p0  ;;  %p1219_p6 = por %p153_p4, %p152_p3 }
   0xb   : > { %p905_p7 = scmp.ge.s32.totalorder %s1114_s21, 1  ;;  %p160_p8 = scmp.lt.s32.totalorder %s1114_s21, 3 }
   0xc   : > { %s1447_s29 = scalar_select %p1219_p6, 1, 0 }
   0xd   : > { %p936_p9 = scmp.eq.s32.totalorder %s1198_s22, 0  ;;  %p1226_p10 = pnand %p905_p7, %p160_p8 }
   0xe   : > { %s1116_s6 = smov [#allocation3]  }
   0xf   : > { %s175_s7 = sshll.u32 %s1116_s6, 4  ;;  %p928_p11 = pneg %p1226_p10  ;;  %s176_s7 = int_to_ptr.vmem [resolvable:$true] %s175_s7 }
  0x10   : > { %s1035_s8 = scalar_lea.vmem %s176_s7, 512  ;;  %p1043_p3 = scmp.lt.s32.totalorder %s176_s7, %s176_s7 }
  0x11   : > { %p929_p12 = pnand %p936_p9, %p928_p11  ;;  %p1036_p0 = scmp.ne.s32.totalorder %s176_s7, %s1035_s8 }
  0x12   : > { %p1044_p4 = scmp.lt.s32.totalorder %s1035_s8, %s1035_s8 }
  0x13   : > { %p1026_p13 = pneg %p929_p12 }
  0x14   : > { %p1045_p6 = por %p1044_p4, %p1043_p3 }
  0x15   : > { %p1038_p1 = pnand %p1036_p0, %p1026_p13 }
  0x17   : > { %p1039_p2 = pneg %p1038_p1 }
  0x19   : > { %p1046_p7 = pnand %p1045_p6, %p1039_p2 }
  0x1b   : > { %1049 = shalt.err (!%p1046_p7)
}
  0x1c   : > { %s1117_s9 = smov 256   ;;  %s1118_s10 = smov 16  }
  0x1d   : > { %931 = dma.hbm_to_vmem [thread:$0]  (!%p929_p12), %s1442_s2, 512, %s176_s7, [#allocation4], %s1117_s9, %s1117_s9, %s1118_s10  }
  0x1e   : > { %205 = sbr.rel (%p1226_p10) target bundleno = 408 (0x198), region = 40 }
  0x23   : > { %1093 = dma.done.wait (%p936_p9), [#allocation4], 512  }
  0x24   : > { %1095 = vsyncadd (%p936_p9), [#allocation4], 4294966784  ;;  %p233_p8 = scmp.lt.s32.totalorder %s1198_s22, 1  ;;  %v271_v0 = vlaneseq  ;;  %v1119_v1 = vmov 2   ;;  %v1120_v2 = vmov 1   ;;  %vm239_vm0 = vcmask 273408  }
  0x25   : > { %1002 = vset.pattern.permute.xlu1 %v1119_v1  ;;  %1001 = vset.pattern.permute.xlu0 %v1120_v2  ;;  %v1121_v4 = vmov 0.0   ;;  %v1258_v6 = vld [vmem:[%s1441_s1] sm:$0xf]  ;;  %v1260_v8 = vld [vmem:[#allocation3] sm:$0xff]  ;;  %s1122_s26 = smov 17   ;;  %v1264_v9 = vld [vmem:[#allocation3 + $0x8] sm:$0xff] }
  0x26   : > { %s234_s13 = scalar_select %p233_p8, %s1198_s22, 1  ;;  %v1247_v3 = vshrl.u32 %v271_v0, 7  ;;  %238 = vst [vmem:[#allocation2] sm:$0xff] %v1121_v4  ;;  %240 = vst.msk [vmem:[#allocation2 + $0x8] sm:$0xf] %vm239_vm0, %v1121_v4  ;;  %343 = vperm.xlu1 %1002, %v1258_v6   ;;  %v1123_v14 = vmov 3  }
  0x27   : > { %v1124_v21 = vmov 4   ;;  %s1125_s30 = smov 1   ;;  %v1126_v27 = vmov 5   ;;  %s1127_s6 = smov 2   ;;  %v1129_v32 = vmov 0   ;;  %v1130_v36 = vmov 6  }
  0x28   : > { %s920_s14 = sshll.u32 %s234_s13, 3  ;;  %v1253_v5 = vsub.s32 1, %v1247_v3  ;;  %v1267_v10 = vsub.s32 2, %v1247_v3  ;;  %v1274_v13 = vsub.s32 3, %v1247_v3  ;;  %v1281_v16 = vsub.s32 4, %v1247_v3  ;;  %s1128_s7 = smov 16  }
  0x29   : > { %s237_s17 = scalar_lea.vmem %s1440_s0, %s920_s14  ;;  %v1296_v26 = vsub.s32 5, %v1247_v3  ;;  %v1303_v31 = vsub.s32 6, %v1247_v3  ;;  %s1131_s8 = smov 18   ;;  %v913_v38 = vld [vmem:[#allocation3 + $0x10] ss:$0 sm:$0xff]  ;;  %v1314_v40 = vsub.s32 7, %v1247_v3 }
  0x2a   : > { %v241_v7 = vld [vmem:[%s237_s17] sm:$0xff]  ;;  %v309_v11 = vrot.slane %v1260_v8, %v1253_v5  ;;  %v313_v12 = vrot.slane %v1264_v9, %v1253_v5  ;;  %1003 = vset.pattern.permute.xlu1 %v1123_v14  ;;  %v358_v15 = vrot.slane %v1260_v8, %v1267_v10  ;;  %v362_v18 = vrot.slane %v1264_v9, %v1267_v10  ;;  %s1132_s9 = smov 32   ;;  %s1134_s10 = smov 34  }
  0x2b   : > { %243 = vrot.lane.b32.xlu0 %v241_v7, %s1122_s26  ;;  %391 = vperm.xlu1 %1003, %v1258_v6   ;;  %v406_v19 = vrot.slane %v1260_v8, %v1274_v13  ;;  %v410_v20 = vrot.slane %v1264_v9, %v1274_v13  ;;  %v454_v22 = vrot.slane %v1260_v8, %v1281_v16  ;;  %v914_v39 = vld [vmem:[#allocation3 + $0x18] ss:$0 sm:$0xff]  ;;  %v1133_v42 = vmov 7   ;;  %s1136_s11 = smov 33   ;;  %s1138_s12 = smov 127  }
  0x2c   : > { %v316_v17 = vcombine.low %v309_v11, %v313_v12  ;;  %v365_v23 = vcombine.low %v358_v15, %v362_v18  ;;  %v458_v25 = vrot.slane %v1264_v9, %v1281_v16  ;;  %v501_v29 = vrot.slane %v1260_v8, %v1296_v26  ;;  %s1139_s13 = smov 126   ;;  %s1140_s14 = smov 112  }
  0x2d   : > { %v413_v24 = vcombine.low %v406_v19, %v410_v20  ;;  %v505_v30 = vrot.slane %v1264_v9, %v1296_v26  ;;  %v549_v34 = vrot.slane %v1260_v8, %v1303_v31  ;;  %v553_v35 = vrot.slane %v1264_v9, %v1303_v31  ;;  %s1141_s15 = smov 111   ;;  %s1142_s16 = smov 110  }
  0x2e   : > { %v461_v28 = vcombine.low %v454_v22, %v458_v25  ;;  %v652_v41 = vcombine.low %v913_v38, %v914_v39  ;;  %v597_v43 = vrot.slane %v1260_v8, %v1314_v40  ;;  %v601_v44 = vrot.slane %v1264_v9, %v1314_v40  ;;  %s1143_s17 = smov 96   ;;  %s1144_s23 = smov 95  }
  0x2f   : > { %294 = vperm.xlu0 %1001, %v1258_v6   ;;  %317 = vrot.lane.b32.xlu1 %v316_v17, %s1125_s30  ;;  %v508_v33 = vcombine.low %v501_v29, %v505_v30  ;;  %v556_v37 = vcombine.low %v549_v34, %v553_v35  ;;  %v1135_v45 = vmov 8   ;;  %v1323_v47 = vsub.s32 0, %v1247_v3  ;;  %s1145_s25 = smov 94  }
  0x30   : > { %1005 = vset.pattern.permute.xlu1 %v1126_v27  ;;  %v604_v46 = vcombine.low %v597_v43, %v601_v44  ;;  %vm250_vm1 = vcmask 1043592   ;;  %vm251_vm2 = vcmask 1047556   ;;  %vm246_vm3 = vcmask 138240  }
  0x31   : > { %v280_v48 = vrot.slane %v1260_v8, %v1323_v47  ;;  %v284_v49 = vrot.slane %v1264_v9, %v1323_v47  ;;  %vm254_vm4 = vcmask 134144   ;;  %vm252_vm5 = vmor %vm251_vm2, %vm250_vm1  ;;  %v1137_v54 = vmov 839922192  }
  0x32   : > { %v269_v55 = vunpack.c.l.s4 %v1137_v54  ;;  %vm320_vm6 = vcmask 7168   ;;  %vm369_vm7 = vcmask 15360   ;;  %vm417_vm8 = vcmask 130048  }
  0x33   : > { %1004 = vset.pattern.permute.xlu0 %v1124_v21  ;;  %366 = vrot.lane.b32.xlu1 %v365_v23, %s1127_s6  ;;  %v1330_v50 = vcombine.low %v280_v48, %v284_v49  ;;  %vm512_vm9 = vcmask 146432   ;;  %vm560_vm10 = vcmask 261120   ;;  %vm608_vm11 = vcmask 269312  }
  0x34   : > { %439 = vperm.xlu0 %1004, %v1258_v6   ;;  %v270_v56 = vunpack.c.0.s8 %v269_v55  ;;  %vm656_vm12 = vcmask 277504   ;;  %vm334_vm13 = vcmask 1043456   ;;  %vm336_vm14 = vcmask 1039360  }
  0x35   : > { %vm384_vm15 = vcmask 1031168   ;;  %vm432_vm0 = vcmask 916480   ;;  %vm479_vm1 = vcmask 908288   ;;  %vm527_vm2 = vcmask 900096  }
  0x36   : > { %v1336_v58 = vsub.s32 %v270_v56, %v1247_v3 }
  0x37   : > { %486 = vperm.xlu1 %1005, %v1258_v6  }
  0x38   : > { %414 = vrot.lane.b32.xlu0 %v413_v24, %s1128_s7 }
  0x39   : > { %1010 = vset.pattern.permute.xlu0 %v1129_v32 }
  0x3b   : > { %1006 = vset.pattern.permute.xlu1 %v1130_v36 }
  0x3c   : > { %462 = vrot.lane.b32.xlu0 %v461_v28, %s1122_s26  ;;  %534 = vperm.xlu1 %1006, %v1258_v6  }
  0x40   : > { %509 = vrot.lane.b32.xlu0 %v508_v33, %s1131_s8  ;;  %1007 = vset.pattern.permute.xlu1 %v1133_v42  ;;  %s230_s8 = sand.u32 1, %s1106_s19  }
  0x41   : > { %582 = vperm.xlu1 %1007, %v1258_v6  }
  0x44   : > { %557 = vrot.lane.b32.xlu0 %v556_v37, %s1132_s9  ;;  %s910_s9 = sshll.u32 %s230_s8, 4 }
  0x45   : > { %1008 = vset.pattern.permute.xlu1 %v1135_v45 }
  0x46   : > { %630 = vperm.xlu1 %1008, %v1258_v6  }
  0x48   : > { %653 = vrot.lane.b32.xlu0 %v652_v41, %s1134_s10  ;;  %s921_s10 = sshll.u32 %s1198_s22, 8  ;;  %s819_s22 = scalar_lea.sflag [#allocation5], %s230_s8 }
  0x4a   : > { %605 = vrot.lane.b32.xlu1 %v604_v46, %s1136_s11  ;;  %s232_s11 = scalar_lea.vmem [#allocation6], %s910_s9 }
  0x4b   : > { %1009 = vset.pattern.permute.xlu1 %v1129_v32 }
  0x4e   : > { %266 = vperm.xlu1 %1009, %v1258_v6  }
  0x52   : > { %1011 = vset.pattern.permute.xlu1 %v1120_v2 }
  0x9d   : > { %v244_v51 = vpop.permute.xlu0 %243 }
  0x9e   : > { %v245_v52 = vrot.slane %v244_v51, 4 }
  0xa0   : > { %v247_v53 = vsel %vm246_vm3, %v245_v52, %v244_v51  ;;  %255 = vst.msk [vmem:[#allocation2 + $0x8] sm:$0xf] %vm254_vm4, %v245_v52  ;;  %vm623_vm4 = vcmask 777216  }
  0xa1   : > { %253 = vst.msk [vmem:[#allocation2] sm:$0xff] %vm252_vm5, %v247_v53  ;;  %v344_v57 = vpop.permute.xlu1 %343  ;;  %vm671_vm5 = vcmask 769024  }
  0xa2   : > { %v351_v4 = vrot.slane %v344_v57, %v1336_v58 }
  0xa6   : > { %v392_v60 = vpop.permute.xlu1 %391 }
  0xa7   : > { %v292_v62 = vld [vmem:[#allocation2 + $0x8] sm:$0xf]  ;;  %v399_v19 = vrot.slane %v392_v60, %v1336_v58 }
  0xa8   : > { %v1339_v2 = vld [vmem:[#allocation2] sm:$0xff]  ;;  %v341_v8 = vld [vmem:[#allocation2 + $0x8] sm:$0xf] }
  0xa9   : > { %v354_v18 = vmul.f32 %v351_v4, %v341_v8  ;;  %v353_v22 = vmul.f32 %v351_v4, %v1339_v2  ;;  %v389_v23 = vld [vmem:[#allocation2 + $0x8] sm:$0xf]  ;;  %v401_v36 = vmul.f32 %v399_v19, %v1339_v2 }
  0xaa   : > { %v295_v59 = vpop.permute.xlu0 %294  ;;  %v318_v63 = vpop.permute.xlu1 %317  ;;  %v402_v30 = vmul.f32 %v399_v19, %v389_v23  ;;  %v437_v38 = vld [vmem:[#allocation2 + $0x8] sm:$0xf] }
  0xab   : > { %v302_v61 = vrot.slane %v295_v59, %v1336_v58  ;;  %v319_v7 = vrot.slane %v318_v63, 4  ;;  %v484_v52 = vld [vmem:[#allocation2 + $0x8] sm:$0xf] }
  0xac   : > { %v532_v60 = vld [vmem:[#allocation2 + $0x8] sm:$0xf] }
  0xad   : > { %v305_v6 = vmul.f32 %v302_v61, %v292_v62  ;;  %v304_v9 = vmul.f32 %v1339_v2, %v302_v61  ;;  %v321_v11 = vsel %vm320_vm6, %v319_v7, %v318_v63 }
  0xae   : > { %v367_v15 = vpop.permute.xlu1 %366 }
  0xaf   : > { %v440_v0 = vpop.permute.xlu0 %439  ;;  %v325_v3 = vmul.f32 %v319_v7, %v305_v6  ;;  %v324_v12 = vmul.f32 %v321_v11, %v304_v9  ;;  %v368_v20 = vrot.slane %v367_v15, 4 }
  0xb0   : > { %v447_v33 = vrot.slane %v440_v0, %v1336_v58 }
  0xb1   : > { %330 = vrot.lane.b32.xlu1 %v325_v3, %s1138_s12  ;;  %328 = vrot.lane.b32.xlu0 %v324_v12, %s1138_s12  ;;  %v370_v24 = vsel %vm369_vm7, %v368_v20, %v367_v15  ;;  %v374_v25 = vmul.f32 %v368_v20, %v354_v18  ;;  %v580_v15 = vld [vmem:[#allocation2 + $0x8] sm:$0xf]  ;;  %s833_s12 = sshll.u32 %s232_s11, 4  ;;  %s1401_s12 = int_to_ptr.vmem [resolvable:$true] %s833_s12 }
  0xb2   : > { %v373_v27 = vmul.f32 %v370_v24, %v353_v22  ;;  %v487_v28 = vpop.permute.xlu1 %486  ;;  %v450_v42 = vmul.f32 %v447_v33, %v437_v38  ;;  %v449_v48 = vmul.f32 %v447_v33, %v1339_v2  ;;  %v628_v22 = vld [vmem:[#allocation2 + $0x8] sm:$0xf]  ;;  %v261_v38 = vld [vmem:[%s1443_s3] sm:$0xff] }
  0xb3   : > { %v415_v17 = vpop.permute.xlu0 %414  ;;  %v494_v43 = vrot.slane %v487_v28, %v1336_v58 }
  0xb4   : > { %v416_v21 = vrot.slane %v415_v17, 4 }
  0xb5   : > { %379 = vrot.lane.b32.xlu1 %v374_v25, %s1139_s13  ;;  %377 = vrot.lane.b32.xlu0 %v373_v27, %s1139_s13  ;;  %v497_v55 = vmul.f32 %v494_v43, %v484_v52  ;;  %v496_v59 = vmul.f32 %v494_v43, %v1339_v2 }
  0xb6   : > { %v418_v34 = vsel %vm417_vm8, %v416_v21, %v415_v17  ;;  %v422_v37 = vmul.f32 %v416_v21, %v402_v30 }
  0xb7   : > { %v463_v29 = vpop.permute.xlu0 %462  ;;  %v421_v39 = vmul.f32 %v418_v34, %v401_v36  ;;  %v535_v46 = vpop.permute.xlu1 %534 }
  0xb8   : > { %v464_v35 = vrot.slane %v463_v29, 4  ;;  %v542_v51 = vrot.slane %v535_v46, %v1336_v58 }
  0xb9   : > { %427 = vrot.lane.b32.xlu1 %v422_v37, %s1140_s14  ;;  %425 = vrot.lane.b32.xlu0 %v421_v39, %s1140_s14 }
  0xba   : > { %v465_v44 = vsel %vm246_vm3, %v464_v35, %v463_v29  ;;  %v469_v49 = vmul.f32 %v464_v35, %v450_v42  ;;  %v545_v63 = vmul.f32 %v542_v51, %v532_v60  ;;  %v544_v6 = vmul.f32 %v542_v51, %v1339_v2 }
  0xbb   : > { %v510_v41 = vpop.permute.xlu0 %509  ;;  %v468_v53 = vmul.f32 %v465_v44, %v449_v48  ;;  %vm575_vm3 = vcmask 785408  }
  0xbc   : > { %v511_v45 = vrot.slane %v510_v41, 4  ;;  %v583_v61 = vpop.permute.xlu1 %582 }
  0xbd   : > { %474 = vrot.lane.b32.xlu1 %v469_v49, %s1141_s15  ;;  %472 = vrot.lane.b32.xlu0 %v468_v53, %s1141_s15  ;;  %v590_v11 = vrot.slane %v583_v61, %v1336_v58  ;;  %s1399_s15 = scalar_lea.hbm %s1445_s5, %s921_s10 }
  0xbe   : > { %v513_v56 = vsel %vm512_vm9, %v511_v45, %v510_v41  ;;  %v517_v62 = vmul.f32 %v511_v45, %v497_v55 }
  0xbf   : > { %v558_v54 = vpop.permute.xlu0 %557  ;;  %v516_v0 = vmul.f32 %v513_v56, %v496_v59  ;;  %v593_v18 = vmul.f32 %v590_v11, %v580_v15  ;;  %v592_v21 = vmul.f32 %v590_v11, %v1339_v2 }
  0xc0   : > { %v559_v57 = vrot.slane %v558_v54, 4 }
  0xc1   : > { %522 = vrot.lane.b32.xlu1 %v517_v62, %s1142_s16  ;;  %520 = vrot.lane.b32.xlu0 %v516_v0, %s1142_s16  ;;  %v631_v8 = vpop.permute.xlu1 %630  ;;  %s1050_s16 = scalar_lea.vmem %s1401_s12, 256 }
  0xc2   : > { %v561_v4 = vsel %vm560_vm10, %v559_v57, %v558_v54  ;;  %v565_v7 = vmul.f32 %v559_v57, %v545_v63  ;;  %v638_v12 = vrot.slane %v631_v8, %v1336_v58  ;;  %p1051_p6 = scmp.ne.s32.totalorder %s1401_s12, %s1050_s16 }
  0xc3   : > { %v564_v9 = vmul.f32 %v561_v4, %v544_v6  ;;  %v654_v3 = vpop.permute.xlu0 %653 }
  0xc4   : > { %v655_v19 = vrot.slane %v654_v3, 4  ;;  %v641_v23 = vmul.f32 %v638_v12, %v628_v22  ;;  %v640_v27 = vmul.f32 %v638_v12, %v1339_v2  ;;  %p1052_p9 = pnand %p1051_p6, %p1215_p5 }
  0xc5   : > { %570 = vrot.lane.b32.xlu1 %v565_v7, %s1143_s17  ;;  %568 = vrot.lane.b32.xlu0 %v564_v9, %s1143_s17  ;;  %v606_v17 = vpop.permute.xlu1 %605  ;;  %s1146_s17 = smov [#allocation6]  }
  0xc6   : > { %v607_v20 = vrot.slane %v606_v17, 4  ;;  %v657_v30 = vsel %vm656_vm12, %v655_v19, %v654_v3  ;;  %v661_v34 = vmul.f32 %v655_v19, %v641_v23  ;;  %p1053_p10 = pneg %p1052_p9 }
  0xc7   : > { %v660_v36 = vmul.f32 %v657_v30, %v640_v27 }
  0xc8   : > { %v609_v24 = vsel %vm608_vm11, %v607_v20, %v606_v17  ;;  %v613_v25 = vmul.f32 %v607_v20, %v593_v18 }
  0xc9   : > { %v612_v28 = vmul.f32 %v609_v24, %v592_v21  ;;  %v267_v29 = vpop.permute.xlu1 %266 }
  0xca   : > { %v274_v33 = vrot.slane %v267_v29, %v1336_v58  ;;  %618 = vrot.lane.b32.xlu1 %v613_v25, %s1144_s23  ;;  %v262_v58 = vld [vmem:[%s1444_s4] sm:$0xff] }
  0xcb   : > { %616 = vrot.lane.b32.xlu0 %v612_v28, %s1144_s23  ;;  %s1054_s23 = sshll.u32 %s1146_s17, 4  ;;  %s1055_s23 = int_to_ptr.vmem [resolvable:$false] %s1054_s23 }
  0xcc   : > { %v276_v35 = vmul.f32 %v1339_v2, %v274_v33  ;;  %p1057_p11 = scmp.lt.s32.totalorder %s1401_s12, %s1055_s23 }
  0xce   : > { %v289_v37 = vmul.f32 %v1330_v50, %v276_v35  ;;  %666 = vrot.lane.b32.xlu1 %v661_v34, %s1145_s25 }
  0xcf   : > { %664 = vrot.lane.b32.xlu0 %v660_v36, %s1145_s25  ;;  %s1056_s25 = scalar_lea.vmem %s1055_s23, 512 }
  0xd0   : > { %p1058_p12 = scmp.lt.s32.totalorder %s1056_s25, %s1050_s16 }
  0xd2   : > { %704 = vperm.xlu1 %1011, %v261_v38   ;;  %p1059_p13 = por %p1058_p12, %p1057_p11 }
  0xd3   : > { %677 = vperm.xlu0 %1010, %v261_v38  }
  0xd4   : > { %p1060_p0 = pnand %p1059_p13, %p1053_p10 }
  0xd6   : > { %1012 = vset.pattern.permute.xlu1 %v1119_v1 }
  0xd7   : > { %730 = vperm.xlu1 %1012, %v261_v38   ;;  %1013 = vset.pattern.permute.xlu0 %v1123_v14 }
  0xd8   : > { %756 = vperm.xlu0 %1013, %v261_v38  }
  0xdb   : > { %1014 = vset.pattern.permute.xlu1 %v1129_v32 }
  0xdc   : > { %783 = vperm.xlu1 %1014, %v262_v58   ;;  %1015 = vset.pattern.permute.xlu0 %v1129_v32 }
 0x123   : > { %v331_v50 = vpop.permute.xlu1 %330  ;;  %v329_v2 = vpop.permute.xlu0 %328 }
 0x124   : > { %v333_v44 = vrot.slane %v331_v50, 4  ;;  %v332_v45 = vrot.slane %v329_v2, 4 }
 0x126   : > { %v335_v51 = vsel %vm334_vm13, %v332_v45, %v333_v44 }
 0x127   : > { %v380_v39 = vpop.permute.xlu1 %379  ;;  %v378_v41 = vpop.permute.xlu0 %377  ;;  %v337_v57 = vsel %vm336_vm14, %v329_v2, %v335_v51 }
 0x128   : > { %v382_v46 = vrot.slane %v380_v39, 4  ;;  %v381_v48 = vrot.slane %v378_v41, 4  ;;  %v339_v4 = vadd.f32 %v337_v57, %v289_v37 }
 0x12a   : > { %v383_v54 = vsel %vm334_vm13, %v381_v48, %v382_v46 }
 0x12b   : > { %v428_v42 = vpop.permute.xlu1 %427  ;;  %v426_v43 = vpop.permute.xlu0 %425  ;;  %v385_v0 = vsel %vm384_vm15, %v378_v41, %v383_v54 }
 0x12c   : > { %v430_v52 = vrot.slane %v428_v42, 4  ;;  %v429_v53 = vrot.slane %v426_v43, 4  ;;  %v387_v11 = vadd.f32 %v385_v0, %v339_v4 }
 0x12e   : > { %v431_v60 = vsel %vm334_vm13, %v429_v53, %v430_v52 }
 0x12f   : > { %v475_v1 = vpop.permute.xlu1 %474  ;;  %v473_v14 = vpop.permute.xlu0 %472  ;;  %v433_v9 = vsel %vm432_vm0, %v426_v43, %v431_v60 }
 0x130   : > { %v477_v55 = vrot.slane %v475_v1, 4  ;;  %v476_v56 = vrot.slane %v473_v14, 4  ;;  %v435_v15 = vadd.f32 %v433_v9, %v387_v11 }
 0x132   : > { %v478_v6 = vsel %vm334_vm13, %v476_v56, %v477_v55 }
 0x133   : > { %v523_v49 = vpop.permute.xlu1 %522  ;;  %v521_v32 = vpop.permute.xlu0 %520  ;;  %v480_v12 = vsel %vm479_vm1, %v473_v14, %v478_v6 }
 0x134   : > { %v525_v61 = vrot.slane %v523_v49, 4  ;;  %v524_v62 = vrot.slane %v521_v32, 4  ;;  %v482_v22 = vadd.f32 %v480_v12, %v435_v15 }
 0x136   : > { %v526_v3 = vsel %vm334_vm13, %v524_v62, %v525_v61 }
 0x137   : > { %v571_v59 = vpop.permute.xlu1 %570  ;;  %v569_v63 = vpop.permute.xlu0 %568  ;;  %v528_v19 = vsel %vm527_vm2, %v521_v32, %v526_v3 }
 0x138   : > { %v573_v7 = vrot.slane %v571_v59, 4  ;;  %v572_v8 = vrot.slane %v569_v63, 4  ;;  %v530_v25 = vadd.f32 %v528_v19, %v482_v22 }
 0x13a   : > { %v574_v17 = vsel %vm334_vm13, %v572_v8, %v573_v7 }
 0x13b   : > { %v576_v24 = vsel %vm575_vm3, %v569_v63, %v574_v17 }
 0x13c   : > { %v619_v18 = vpop.permute.xlu1 %618  ;;  %v578_v34 = vadd.f32 %v576_v24, %v530_v25 }
 0x13d   : > { %v621_v20 = vrot.slane %v619_v18, 4  ;;  %v617_v21 = vpop.permute.xlu0 %616 }
 0x13e   : > { %v620_v23 = vrot.slane %v617_v21, 4 }
 0x140   : > { %v622_v27 = vsel %vm334_vm13, %v620_v23, %v621_v20  ;;  %v667_v28 = vpop.permute.xlu1 %666 }
 0x141   : > { %v624_v29 = vsel %vm623_vm4, %v617_v21, %v622_v27  ;;  %v669_v30 = vrot.slane %v667_v28, 4  ;;  %v665_v33 = vpop.permute.xlu0 %664 }
 0x142   : > { %v668_v35 = vrot.slane %v665_v33, 4  ;;  %v626_v36 = vadd.f32 %v624_v29, %v578_v34 }
 0x144   : > { %v670_v37 = vsel %vm334_vm13, %v668_v35, %v669_v30 }
 0x145   : > { %v672_v38 = vsel %vm671_vm5, %v665_v33, %v670_v37 }
 0x146   : > { %v674_v58 = vadd.f32 %v672_v38, %v626_v36 }
 0x148   : > { %v710_v50 = vrot.slane %v674_v58, %v1253_v5  ;;  %v714_v2 = vrot.slane %v674_v58, %v1296_v26  ;;  %v684_v39 = vrot.slane %v674_v58, %v1323_v47  ;;  %v688_v41 = vrot.slane %v674_v58, %v1281_v16 }
 0x149   : > { %v736_v14 = vrot.slane %v674_v58, %v1267_v10  ;;  %v740_v46 = vrot.slane %v674_v58, %v1303_v31  ;;  %v762_v51 = vrot.slane %v674_v58, %v1274_v13  ;;  %v766_v16 = vrot.slane %v674_v58, %v1314_v40 }
 0x14a   : > { %v694_v42 = vrot.slane %v684_v39, %v1323_v47  ;;  %v698_v43 = vrot.slane %v688_v41, %v1323_v47  ;;  %v720_v1 = vrot.slane %v710_v50, %v1253_v5  ;;  %v724_v44 = vrot.slane %v714_v2, %v1253_v5 }
 0x14b   : > { %v746_v54 = vrot.slane %v736_v14, %v1267_v10  ;;  %v750_v5 = vrot.slane %v740_v46, %v1267_v10  ;;  %v772_v56 = vrot.slane %v762_v51, %v1274_v13  ;;  %v776_v31 = vrot.slane %v766_v16, %v1274_v13 }
 0x14d   : > { %v705_v45 = vpop.permute.xlu1 %704 }
 0x14e   : > { %v725_v48 = vmul.f32 %v720_v1, %v705_v45  ;;  %v726_v49 = vmul.f32 %v724_v44, %v705_v45  ;;  %v678_v26 = vpop.permute.xlu0 %677 }
 0x14f   : > { %v699_v52 = vmul.f32 %v694_v42, %v678_v26  ;;  %v700_v53 = vmul.f32 %v698_v43, %v678_v26 }
 0x151   : > { %v727_v32 = vadd.f32 %v725_v48, %v699_v52  ;;  %v728_v47 = vadd.f32 %v726_v49, %v700_v53 }
 0x152   : > { %v731_v55 = vpop.permute.xlu1 %730 }
 0x153   : > { %v751_v57 = vmul.f32 %v746_v54, %v731_v55  ;;  %v752_v59 = vmul.f32 %v750_v5, %v731_v55  ;;  %v757_v60 = vpop.permute.xlu0 %756 }
 0x154   : > { %v777_v61 = vmul.f32 %v772_v56, %v757_v60  ;;  %v778_v62 = vmul.f32 %v776_v31, %v757_v60 }
 0x155   : > { %v753_v63 = vadd.f32 %v751_v57, %v727_v32  ;;  %v754_v40 = vadd.f32 %v752_v59, %v728_v47 }
 0x157   : > { %v784_v0 = vpop.permute.xlu1 %783  ;;  %v779_v4 = vadd.f32 %v777_v61, %v753_v63  ;;  %v780_v6 = vadd.f32 %v778_v62, %v754_v40 }
 0x159   : > { %v786_v7 = vadd.f32 %v784_v0, %v779_v4  ;;  %v787_v8 = vadd.f32 %v784_v0, %v780_v6 }
 0x15b   : > { %v788_v9 = vmin.f32 %v786_v7, 20.0  ;;  %v789_v10 = vmin.f32 %v787_v8, 20.0  ;;  %vm812_vm6 = vcmp.gt.f32.partialorder %v786_v7, 20.0  ;;  %vm813_vm7 = vcmp.gt.f32.partialorder %v787_v8, 20.0 }
 0x15d   : > { %v790_v11 = vmul.f32 1.442695, %v788_v9  ;;  %v792_v3 = vmul.f32 1.442695, %v789_v10 }
 0x15f   : > { %1016 = vpow2.f32 %v790_v11 }
 0x160   : > { %1018 = vpow2.f32 %v792_v3 }
 0x16c   : > { %v1017_v13 = vpop.eup %1016 }
 0x16d   : > { %v1019_v12 = vpop.eup %1018  ;;  %v794_v15 = vadd.f32 2.0, %v1017_v13 }
 0x16e   : > { %v795_v17 = vadd.f32 2.0, %v1019_v12 }
 0x16f   : > { %v796_v18 = vmul.f32 %v1017_v13, %v794_v15 }
 0x170   : > { %v797_v19 = vmul.f32 %v1019_v12, %v795_v17 }
 0x171   : > { %v798_v20 = vadd.f32 2.0, %v796_v18  ;;  %v808_v30 = vmul.f32 %v796_v18, %v786_v7 }
 0x172   : > { %v799_v21 = vadd.f32 2.0, %v797_v19  ;;  %v809_v34 = vmul.f32 %v797_v19, %v787_v8 }
 0x173   : > { %1020 = vrcp.f32 %v798_v20 }
 0x174   : > { %1022 = vrcp.f32 %v799_v21 }
 0x180   : > { %v1021_v22 = vpop.eup %1020 }
 0x181   : > { %v1023_v23 = vpop.eup %1022  ;;  %v802_v24 = vmul.f32 %v1021_v22, %v798_v20 }
 0x182   : > { %v803_v25 = vmul.f32 %v1023_v23, %v799_v21 }
 0x183   : > { %v804_v27 = vsub.f32 2.0, %v802_v24 }
 0x184   : > { %v805_v28 = vsub.f32 2.0, %v803_v25 }
 0x185   : > { %v806_v29 = vmul.f32 %v1021_v22, %v804_v27 }
 0x186   : > { %v807_v33 = vmul.f32 %v1023_v23, %v805_v28 }
 0x187   : > { %v810_v35 = vmul.f32 %v808_v30, %v806_v29 }
 0x188   : > { %v811_v36 = vmul.f32 %v809_v34, %v807_v33 }
 0x189   : > { %v814_v37 = vsel %vm812_vm6, %v786_v7, %v810_v35 }
 0x18a   : > { %v815_v38 = vsel %vm813_vm7, %v787_v8, %v811_v36  ;;  %816 = vst [vmem:[%s232_s11] sm:$0xff] %v814_v37 }
 0x18b   : > { %817 = vst [vmem:[%s232_s11 + $0x8] sm:$0xff] %v815_v38 }
 0x18c   : > { %1063 = shalt.err (!%p1060_p0)
}
 0x18d   : > { %s1064_s26 = scalar_lea.hbm %s1399_s15, 256  ;;  %s1068_s7 = scalar_lea.hbm %s1445_s5, 512 }
 0x18e   : > { %p1065_p1 = scmp.ne.s32.totalorder %s1399_s15, %s1064_s26  ;;  %p1069_p4 = scmp.lt.s32.totalorder %s1399_s15, %s1445_s5 }
 0x18f   : > { %p1070_p7 = scmp.lt.s32.totalorder %s1068_s7, %s1064_s26 }
 0x190   : > { %p1066_p2 = pnand %p1065_p1, %p1215_p5 }
 0x191   : > { %p1071_p8 = por %p1070_p7, %p1069_p4 }
 0x192   : > { %p1067_p3 = pneg %p1066_p2 }
 0x194   : > { %p1072_p6 = pnand %p1071_p8, %p1067_p3 }
 0x196   : > { %1075 = shalt.err (!%p1072_p6)
}
 0x197   : > { %926 = dma.vmem_to_hbm [thread:$0]  (%p1215_p5), %s1401_s12, 256, %s1399_s15, %s819_s22  }
 0x198 PF: > { %p938_p9 = scmp.ge.s32.totalorder %s1114_s21, 2  ;;  %s845_s10 = sand.u32 1, %s1102_s18  }
 0x199   : > { %p1449_p10 = scmp.ne.s32.totalorder %s1447_s29, 0  ;;  %s846_s11 = scalar_lea.sflag [#allocation5], %s845_s10 }
 0x19b   : > { %p933_p11 = pnand %p938_p9, %p1449_p10 }
 0x19d   : > { %p934_p12 = pneg %p933_p11 }
 0x19f   : > { %1097 = dma.done.wait (%p934_p12), %s846_s11, 256  }
 0x1a0   : > { %1099 = vsyncadd (%p934_p12), %s846_s11, 4294967040  ;;  %p16_p13 = scmp.ge.s32.totalorder %s1202_s24, 4   ;;  %s1450_s18 = smov %s1106_s19 }
 0x1a1   : > { %s1451_s19 = smov %s1110_s20  ;;  %s1452_s20 = smov %s1213_s27 }
 0x1a2   : > { %s1453_s21 = smov %s1202_s24  ;;  %18 = sbr.rel (!%p16_p13) target bundleno = 4 (0x4), region = 80 }
 0x1a7   :  { %851 = vsyncpa [#allocation4], 1 }
 0x1a8   :  { %853 = vsyncpa [#allocation4 + $0x1], 1 }
 0x1a9   :  { %854 = vsyncpa [#allocation5], 1 }
 0x1aa   :  { %856 = vsyncpa [#allocation5 + $0x1], 1 }

</bundles_post_ra>
